<compile_context>
chip_gen: v6e
topology: v6e:2x2x1
jax: 0.10.0
libtpu: 0.0.40
codegen_flags: <defaults>
</compile_context>

<pallas_src>
import math

import jax
import jax.numpy as jnp
from jax import lax
from jax.experimental import pallas as pl
from jax.experimental.pallas import tpu as pltpu


def _make_flash_kernel(head_dim: int):
    scale = 1.0 / math.sqrt(float(head_dim))

    def kernel(q_ref, k_ref, v_ref, o_ref, qs_ref, m_sc, l_sc, acc_sc):
        ki = pl.program_id(2)

        @pl.when(ki == 0)
        def _():
            # Scale Q once per (head-group, query-tile), in the input dtype.
            qs_ref[...] = q_ref[...] * scale
            m_sc[...] = jnp.full(m_sc.shape, -jnp.inf, dtype=jnp.float32)
            l_sc[...] = jnp.zeros(l_sc.shape, dtype=jnp.float32)
            acc_sc[...] = jnp.zeros(acc_sc.shape, dtype=jnp.float32)

        q = qs_ref[...]              # (G, Sq, D)  input dtype, pre-scaled
        k = k_ref[...]               # (G, Tkv, D) input dtype
        v = v_ref[...]               # (G, Tkv, D) input dtype

        # Batched QK^T contracting on the shared last dim (no explicit k.T);
        # f32 accumulation on the MXU, operands stay in the input dtype.
        s = lax.dot_general(
            q, k,
            dimension_numbers=(((2,), (2,)), ((0,), (0,))),
            preferred_element_type=jnp.float32,
        )                            # (G, Sq, Tkv) f32

        # Online softmax update (f32 statistics).
        m_prev = m_sc[...]
        m_new = jnp.maximum(m_prev, jnp.max(s, axis=-1, keepdims=True))
        alpha = jnp.exp(m_prev - m_new)
        p = jnp.exp(s - m_new)
        l_sc[...] = alpha * l_sc[...] + jnp.sum(p, axis=-1, keepdims=True)

        pv = lax.dot_general(
            p.astype(v.dtype), v,    # p in v's dtype -> native MXU rate for bf16
            dimension_numbers=(((2,), (1,)), ((0,), (0,))),
            preferred_element_type=jnp.float32,
        )                            # (G, Sq, D) f32
        acc_sc[...] = alpha * acc_sc[...] + pv
        m_sc[...] = m_new

        @pl.when(ki == pl.num_programs(2) - 1)
        def _():
            # Exact reciprocal: approx=True was too coarse for f32 outputs.
            inv_l = 1.0 / l_sc[...]
            o_ref[...] = (acc_sc[...] * inv_l).astype(o_ref.dtype)

    return kernel


def _round_up(x, m):
    return -(-x // m) * m


def _padded_bytes(shape, dtype):
    """VMEM bytes for an array, accounting for (sublane, lane) tile padding."""
    itemsize = jnp.dtype(dtype).itemsize
    packing = max(1, 4 // itemsize)          # f32 -> 1, bf16 -> 2, int8 -> 4
    lane = _round_up(shape[-1], 128)
    sub = _round_up(shape[-2], 8 * packing) if len(shape) >= 2 else 1
    lead = 1
    for d in shape[:-2]:
        lead *= d
    return lead * sub * lane * itemsize


def _footprint_bytes(g, sq, tkv, d, in_dtype, out_dtype):
    """Rough per-step VMEM footprint: double-buffered blocks + scratch + temps."""
    f = 0
    f += 2 * _padded_bytes((g, sq, d), in_dtype)        # q (double buffered)
    f += 2 * 2 * _padded_bytes((g, tkv, d), in_dtype)   # k, v (double buffered)
    f += 2 * _padded_bytes((g, sq, d), out_dtype)       # o (double buffered)
    f += _padded_bytes((g, sq, d), in_dtype)            # scaled-Q scratch
    f += 2 * _padded_bytes((g, sq, 1), jnp.float32)     # m, l (pad to 128 lanes)
    f += _padded_bytes((g, sq, d), jnp.float32)         # acc
    f += 2 * _padded_bytes((g, sq, tkv), jnp.float32)   # s, p temporaries
    f += _padded_bytes((g, sq, tkv), in_dtype)          # p cast for the PV matmul
    return f


def _tpu_memory_model():
    """(vmem_capacity_bytes, multi_tensorcore?) with safe fallbacks."""
    vmem_cap = 128 * 1024 * 1024
    try:
        vmem_cap = int(pltpu.get_tpu_info().vmem_capacity_bytes)
    except Exception:
        pass
    multi_tc = vmem_cap <= 64 * 1024 * 1024     # v7x-class: 2 TCs, 64 MiB/TC
    try:
        kind = jax.devices()[0].device_kind.lower()
        if "v5 lite" in kind or "v5e" in kind or "v6" in kind or "trillium" in kind:
            multi_tc = False                    # single TensorCore chips
        elif "7" in kind or "v4" in kind or "v5p" in kind:
            multi_tc = True
    except Exception:
        pass
    return vmem_cap, multi_tc


def _vmem_budgets(vmem_cap):
    if vmem_cap <= 64 * 1024 * 1024:            # v7x-class (64 MiB per core)
        return 24 * 1024 * 1024, 48 * 1024 * 1024
    return 64 * 1024 * 1024, 100 * 1024 * 1024  # v5e / v6e (128 MiB)


def _pick_seq_tile(s, cap=512):
    """Largest divisor of S that is a multiple of 128 and <= cap; S otherwise."""
    if s <= cap:
        return s
    best = None
    t = 128
    while t <= cap:
        if s % t == 0:
            best = t
        t += 128
    return best if best is not None else s


def _choose_head_group(bh, sq, tkv, d, in_dtype, out_dtype, budget, multi_tc):
    """Largest head-group G that divides BH, fits the VMEM budget, and (only on
    multi-TensorCore chips) keeps the head-group grid axis >= 2."""
    best = 1
    for g in range(1, bh + 1):
        if bh % g:
            continue
        if multi_tc and bh >= 2 and bh // g < 2:
            continue
        if _footprint_bytes(g, sq, tkv, d, in_dtype, out_dtype) <= budget:
            best = g
    return best


def attention(query, key, value, num_heads):
    """query/key/value: [B, H, S, D].  mask=None path of the module."""
    B, H, S, D = query.shape
    assert H == num_heads
    BH = B * H

    q = query.reshape(BH, S, D)
    k = key.reshape(BH, S, D)
    v = value.reshape(BH, S, D)

    vmem_cap, multi_tc = _tpu_memory_model()
    budget, vmem_limit = _vmem_budgets(vmem_cap)

    kv_tile = _pick_seq_tile(S)     # KV tile for the online-softmax loop
    sq_tile = _pick_seq_tile(S)     # query-sequence tile (bounds VMEM vs S)

    G = _choose_head_group(BH, sq_tile, kv_tile, D, q.dtype, query.dtype,
                           budget, multi_tc)
    grid = (BH // G, S // sq_tile, S // kv_tile)

    kernel = _make_flash_kernel(D)

    q_spec = pl.BlockSpec((G, sq_tile, D), lambda i, qi, ki: (i, qi, 0))
    kv_spec = pl.BlockSpec((G, kv_tile, D), lambda i, qi, ki: (i, ki, 0))
    o_spec = pl.BlockSpec((G, sq_tile, D), lambda i, qi, ki: (i, qi, 0))

    out = pl.pallas_call(
        kernel,
        out_shape=jax.ShapeDtypeStruct((BH, S, D), query.dtype),
        grid_spec=pltpu.PrefetchScalarGridSpec(
            num_scalar_prefetch=0,
            grid=grid,
            in_specs=[q_spec, kv_spec, kv_spec],
            out_specs=o_spec,
            scratch_shapes=[
                pltpu.VMEM((G, sq_tile, D), q.dtype),      # pre-scaled Q
                pltpu.VMEM((G, sq_tile, 1), jnp.float32),  # running max
                pltpu.VMEM((G, sq_tile, 1), jnp.float32),  # running sum
                pltpu.VMEM((G, sq_tile, D), jnp.float32),  # accumulator
            ],
        ),
        compiler_params=pltpu.CompilerParams(
            dimension_semantics=("parallel", "parallel", "arbitrary"),
            vmem_limit_bytes=vmem_limit,
        ),
    )(q, k, v)

    return out.reshape(B, H, S, D)


def attention_ref(query, key, value, head_dim):
    scores = jnp.einsum("bhqd,bhkd->bhqk", query, key,
                        precision=lax.Precision.HIGHEST)
    scores = scores / math.sqrt(float(head_dim))
    weights = jax.nn.softmax(scores, axis=-1)
    return jnp.einsum("bhqk,bhkd->bhqd", weights, value,
                      precision=lax.Precision.HIGHEST)


if __name__ == "__main__":
    # Small shapes consistent with the module: model_dim = num_heads * head_dim.
    B = 2
    num_heads = 4
    head_dim = 8          # model_dim = 32 -> head_dim = model_dim // num_heads
    S = 8

    rng = jax.random.PRNGKey(0)
    kq, kk, kv_ = jax.random.split(rng, 3)
    query = jax.random.normal(kq, (B, num_heads, S, head_dim), dtype=jnp.float32)
    key_t = jax.random.normal(kk, (B, num_heads, S, head_dim), dtype=jnp.float32)
    value = jax.random.normal(kv_, (B, num_heads, S, head_dim), dtype=jnp.float32)

    out = attention(query, key_t, value, num_heads)
    out = jax.block_until_ready(out)

    ref = attention_ref(query, key_t, value, head_dim)
    max_err = float(jnp.max(jnp.abs(out - ref)))
    assert jnp.allclose(out, ref, atol=2e-3, rtol=2e-3), (
        f"mismatch vs reference (max abs err {max_err})")

    # TODO(synk): mask (masked_fill_ with -inf) path not implemented; the
    # module's default call path is mask=None.
    print("KERNEL_OK")
</pallas_src>

<mosaic_0001>
module attributes {stable_mosaic.version = 11 : i64} {
  func.func @kernel(%arg0: i32, %arg1: i32, %arg2: i32, %arg3: memref<8x8x8xf32, #tpu.memory_space<vmem>>, %arg4: memref<8x8x8xf32, #tpu.memory_space<vmem>>, %arg5: memref<8x8x8xf32, #tpu.memory_space<vmem>>, %arg6: memref<8x8x8xf32, #tpu.memory_space<vmem>>, %arg7: memref<8x8x8xf32, #tpu.memory_space<vmem>>, %arg8: memref<8x8x1xf32, #tpu.memory_space<vmem>>, %arg9: memref<8x8x1xf32, #tpu.memory_space<vmem>>, %arg10: memref<8x8x8xf32, #tpu.memory_space<vmem>>) attributes {dimension_semantics = [#tpu.dimension_semantics<parallel>, #tpu.dimension_semantics<parallel>, #tpu.dimension_semantics<arbitrary>], iteration_bounds = array<i64: 1, 1, 1>, scalar_prefetch = 0 : i64, scratch_operands = 4 : i64, tpu.core_type = #tpu.core_type<tc>, window_params = [{transform_indices = @transform_0, window_bounds = array<i64: 8, 8, 8>}, {transform_indices = @transform_1, window_bounds = array<i64: 8, 8, 8>}, {transform_indices = @transform_2, window_bounds = array<i64: 8, 8, 8>}, {transform_indices = @transform_3, window_bounds = array<i64: 8, 8, 8>}]} {
    %c0_i32 = arith.constant 0 : i32
    %0 = arith.cmpi eq, %arg2, %c0_i32 : i32
    %1 = arith.extui %0 : i1 to i32
    %c0_i32_0 = arith.constant 0 : i32
    %2 = arith.cmpi ne, %1, %c0_i32_0 : i32
    scf.if %2 {
      %c0_32 = arith.constant 0 : index
      %c0_33 = arith.constant 0 : index
      %c0_34 = arith.constant 0 : index
      %32 = vector.load %arg3[%c0_32, %c0_33, %c0_34] : memref<8x8x8xf32, #tpu.memory_space<vmem>>, vector<8x8x8xf32>
      %cst_35 = arith.constant 0.353553385 : f32
      %33 = vector.broadcast %cst_35 : f32 to vector<8x8x8xf32>
      %34 = arith.mulf %32, %33 : vector<8x8x8xf32>
      %c0_36 = arith.constant 0 : index
      %c0_37 = arith.constant 0 : index
      %c0_38 = arith.constant 0 : index
      %35 = vector.load %arg7[%c0_36, %c0_37, %c0_38] : memref<8x8x8xf32, #tpu.memory_space<vmem>>, vector<8x8x8xf32>
      tpu.vector_store %arg7[%c0_36, %c0_37, %c0_38], %34 {strides = array<i32>} : memref<8x8x8xf32, #tpu.memory_space<vmem>>, vector<8x8x8xf32>,
      %cst_39 = arith.constant 0xFF800000 : f32
      %36 = vector.broadcast %cst_39 : f32 to vector<8x8x1xf32>
      %c0_40 = arith.constant 0 : index
      %c0_41 = arith.constant 0 : index
      %c0_42 = arith.constant 0 : index
      %37 = vector.load %arg8[%c0_40, %c0_41, %c0_42] : memref<8x8x1xf32, #tpu.memory_space<vmem>>, vector<8x8x1xf32>
      tpu.vector_store %arg8[%c0_40, %c0_41, %c0_42], %36 {strides = array<i32>} : memref<8x8x1xf32, #tpu.memory_space<vmem>>, vector<8x8x1xf32>,
      %cst_43 = arith.constant 0.000000e+00 : f32
      %38 = vector.broadcast %cst_43 : f32 to vector<8x8x1xf32>
      %c0_44 = arith.constant 0 : index
      %c0_45 = arith.constant 0 : index
      %c0_46 = arith.constant 0 : index
      %39 = vector.load %arg9[%c0_44, %c0_45, %c0_46] : memref<8x8x1xf32, #tpu.memory_space<vmem>>, vector<8x8x1xf32>
      tpu.vector_store %arg9[%c0_44, %c0_45, %c0_46], %38 {strides = array<i32>} : memref<8x8x1xf32, #tpu.memory_space<vmem>>, vector<8x8x1xf32>,
      %cst_47 = arith.constant 0.000000e+00 : f32
      %40 = vector.broadcast %cst_47 : f32 to vector<8x8x8xf32>
      %c0_48 = arith.constant 0 : index
      %c0_49 = arith.constant 0 : index
      %c0_50 = arith.constant 0 : index
      %41 = vector.load %arg10[%c0_48, %c0_49, %c0_50] : memref<8x8x8xf32, #tpu.memory_space<vmem>>, vector<8x8x8xf32>
      tpu.vector_store %arg10[%c0_48, %c0_49, %c0_50], %40 {strides = array<i32>} : memref<8x8x8xf32, #tpu.memory_space<vmem>>, vector<8x8x8xf32>,
    } else {
    }
    %c0 = arith.constant 0 : index
    %c0_1 = arith.constant 0 : index
    %c0_2 = arith.constant 0 : index
    %3 = vector.load %arg7[%c0, %c0_1, %c0_2] : memref<8x8x8xf32, #tpu.memory_space<vmem>>, vector<8x8x8xf32>
    %c0_3 = arith.constant 0 : index
    %c0_4 = arith.constant 0 : index
    %c0_5 = arith.constant 0 : index
    %4 = vector.load %arg4[%c0_3, %c0_4, %c0_5] : memref<8x8x8xf32, #tpu.memory_space<vmem>>, vector<8x8x8xf32>
    %c0_6 = arith.constant 0 : index
    %c0_7 = arith.constant 0 : index
    %c0_8 = arith.constant 0 : index
    %5 = vector.load %arg5[%c0_6, %c0_7, %c0_8] : memref<8x8x8xf32, #tpu.memory_space<vmem>>, vector<8x8x8xf32>
    %cst = arith.constant dense<0.000000e+00> : vector<8x8x8xf32>
    %6 = tpu.matmul %3, %4, %cst {dimension_numbers = #tpu.dot_dimension_numbers<[2], [2], [1], [1], [0, 0, 0, 1, 1, 1], [0], [0]>} : vector<8x8x8xf32>, vector<8x8x8xf32>, vector<8x8x8xf32> -> vector<8x8x8xf32>
    %c0_9 = arith.constant 0 : index
    %c0_10 = arith.constant 0 : index
    %c0_11 = arith.constant 0 : index
    %7 = vector.load %arg8[%c0_9, %c0_10, %c0_11] : memref<8x8x1xf32, #tpu.memory_space<vmem>>, vector<8x8x1xf32>
    %cst_12 = arith.constant dense<0xFF800000> : vector<8x8xf32>
    %8 = vector.multi_reduction <maximumf>, %6, %cst_12 [2] : vector<8x8x8xf32> to vector<8x8xf32>
    %9 = vector.shape_cast %8 : vector<8x8xf32> to vector<8x8x1xf32>
    %10 = arith.maximumf %7, %9 : vector<8x8x1xf32>
    %11 = arith.subf %7, %10 : vector<8x8x1xf32>
    %12 = math.exp %11 : vector<8x8x1xf32>
    %13 = vector.broadcast %10 : vector<8x8x1xf32> to vector<8x8x8xf32>
    %14 = arith.subf %6, %13 : vector<8x8x8xf32>
    %15 = math.exp %14 : vector<8x8x8xf32>
    %c0_13 = arith.constant 0 : index
    %c0_14 = arith.constant 0 : index
    %c0_15 = arith.constant 0 : index
    %16 = vector.load %arg9[%c0_13, %c0_14, %c0_15] : memref<8x8x1xf32, #tpu.memory_space<vmem>>, vector<8x8x1xf32>
    %17 = arith.mulf %12, %16 : vector<8x8x1xf32>
    %cst_16 = arith.constant dense<0.000000e+00> : vector<8x8xf32>
    %18 = vector.multi_reduction <add>, %15, %cst_16 [2] : vector<8x8x8xf32> to vector<8x8xf32>
    %19 = vector.shape_cast %18 : vector<8x8xf32> to vector<8x8x1xf32>
    %20 = arith.addf %17, %19 : vector<8x8x1xf32>
    %c0_17 = arith.constant 0 : index
    %c0_18 = arith.constant 0 : index
    %c0_19 = arith.constant 0 : index
    %21 = vector.load %arg9[%c0_17, %c0_18, %c0_19] : memref<8x8x1xf32, #tpu.memory_space<vmem>>, vector<8x8x1xf32>
    tpu.vector_store %arg9[%c0_17, %c0_18, %c0_19], %20 {strides = array<i32>} : memref<8x8x1xf32, #tpu.memory_space<vmem>>, vector<8x8x1xf32>,
    %cst_20 = arith.constant dense<0.000000e+00> : vector<8x8x8xf32>
    %22 = tpu.matmul %15, %5, %cst_20 {dimension_numbers = #tpu.dot_dimension_numbers<[2], [1], [1], [2], [0, 0, 0, 1, 1, 2], [0], [0]>} : vector<8x8x8xf32>, vector<8x8x8xf32>, vector<8x8x8xf32> -> vector<8x8x8xf32>
    %c0_21 = arith.constant 0 : index
    %c0_22 = arith.constant 0 : index
    %c0_23 = arith.constant 0 : index
    %23 = vector.load %arg10[%c0_21, %c0_22, %c0_23] : memref<8x8x8xf32, #tpu.memory_space<vmem>>, vector<8x8x8xf32>
    %24 = vector.broadcast %12 : vector<8x8x1xf32> to vector<8x8x8xf32>
    %25 = arith.mulf %24, %23 : vector<8x8x8xf32>
    %26 = arith.addf %25, %22 : vector<8x8x8xf32>
    %c0_24 = arith.constant 0 : index
    %c0_25 = arith.constant 0 : index
    %c0_26 = arith.constant 0 : index
    %27 = vector.load %arg10[%c0_24, %c0_25, %c0_26] : memref<8x8x8xf32, #tpu.memory_space<vmem>>, vector<8x8x8xf32>
    tpu.vector_store %arg10[%c0_24, %c0_25, %c0_26], %26 {strides = array<i32>} : memref<8x8x8xf32, #tpu.memory_space<vmem>>, vector<8x8x8xf32>,
    %c0_27 = arith.constant 0 : index
    %c0_28 = arith.constant 0 : index
    %c0_29 = arith.constant 0 : index
    %28 = vector.load %arg8[%c0_27, %c0_28, %c0_29] : memref<8x8x1xf32, #tpu.memory_space<vmem>>, vector<8x8x1xf32>
    tpu.vector_store %arg8[%c0_27, %c0_28, %c0_29], %10 {strides = array<i32>} : memref<8x8x1xf32, #tpu.memory_space<vmem>>, vector<8x8x1xf32>,
    %c0_i32_30 = arith.constant 0 : i32
    %29 = arith.cmpi eq, %arg2, %c0_i32_30 : i32
    %30 = arith.extui %29 : i1 to i32
    %c0_i32_31 = arith.constant 0 : i32
    %31 = arith.cmpi ne, %30, %c0_i32_31 : i32
    scf.if %31 {
      %c0_32 = arith.constant 0 : index
      %c0_33 = arith.constant 0 : index
      %c0_34 = arith.constant 0 : index
      %32 = vector.load %arg9[%c0_32, %c0_33, %c0_34] : memref<8x8x1xf32, #tpu.memory_space<vmem>>, vector<8x8x1xf32>
      %cst_35 = arith.constant 1.000000e+00 : f32
      %33 = vector.broadcast %cst_35 : f32 to vector<8x8x1xf32>
      %34 = arith.divf %33, %32 : vector<8x8x1xf32>
      %c0_36 = arith.constant 0 : index
      %c0_37 = arith.constant 0 : index
      %c0_38 = arith.constant 0 : index
      %35 = vector.load %arg10[%c0_36, %c0_37, %c0_38] : memref<8x8x8xf32, #tpu.memory_space<vmem>>, vector<8x8x8xf32>
      %36 = vector.broadcast %34 : vector<8x8x1xf32> to vector<8x8x8xf32>
      %37 = arith.mulf %35, %36 : vector<8x8x8xf32>
      %c0_39 = arith.constant 0 : index
      %c0_40 = arith.constant 0 : index
      %c0_41 = arith.constant 0 : index
      %38 = vector.load %arg6[%c0_39, %c0_40, %c0_41] : memref<8x8x8xf32, #tpu.memory_space<vmem>>, vector<8x8x8xf32>
      tpu.vector_store %arg6[%c0_39, %c0_40, %c0_41], %37 {strides = array<i32>} : memref<8x8x8xf32, #tpu.memory_space<vmem>>, vector<8x8x8xf32>,
    } else {
    }
    return
  }
  func.func @transform_0(%arg0: i32, %arg1: i32, %arg2: i32) -> (i32, i32, i32) {
    %c0_i32 = arith.constant 0 : i32
    %c0_i32_0 = arith.constant 0 : i32
    return %arg0, %arg1, %c0_i32 : i32, i32, i32
  }
  func.func @transform_1(%arg0: i32, %arg1: i32, %arg2: i32) -> (i32, i32, i32) {
    %c0_i32 = arith.constant 0 : i32
    %c0_i32_0 = arith.constant 0 : i32
    return %arg0, %arg2, %c0_i32 : i32, i32, i32
  }
  func.func @transform_2(%arg0: i32, %arg1: i32, %arg2: i32) -> (i32, i32, i32) {
    %c0_i32 = arith.constant 0 : i32
    %c0_i32_0 = arith.constant 0 : i32
    return %arg0, %arg2, %c0_i32 : i32, i32, i32
  }
  func.func @transform_3(%arg0: i32, %arg1: i32, %arg2: i32) -> (i32, i32, i32) {
    %c0_i32 = arith.constant 0 : i32
    %c0_i32_0 = arith.constant 0 : i32
    return %arg0, %arg1, %c0_i32 : i32, i32, i32
  }
}

</mosaic_0001>

<bundles_post_ra>
// kernel: tpu_custom_call.1
= control target key start
LH: loop header
LB: loop body
LE: loop exit
PB: predicated region body
PF: predicated region fallthrough
CT: control target
= control target key end

     0   :  { %8 = vsyncpa [#allocation7], 0  ;;  %s2333_s0 = inlined_call_operand.hbm [shape: f32[8,8,8], index: 0, kind: input, shape index: {}]   ;;  %s2334_s1 = inlined_call_operand.hbm [shape: f32[8,8,8], index: 1, kind: input, shape index: {}]   ;;  %s2335_s2 = inlined_call_operand.hbm [shape: f32[8,8,8], index: 2, kind: input, shape index: {}]   ;;  %s2336_s3 = inlined_call_operand.hbm [shape: f32[8,8,8], index: 3, kind: output, shape index: {}]  }
   0x1   :  { %9 = vsyncpa [#allocation10], 0 }
   0x2   :  { %10 = vsyncpa [#allocation8], 0  ;;  %s1983_s12 = smov [#allocation9]   ;;  %s1984_s14 = smov [#allocation6]  }
   0x3   :  { %s28_s13 = sshll.u32 %s1983_s12, 4  ;;  %s16_s15 = sshll.u32 %s1984_s14, 4  ;;  %s29_s13 = int_to_ptr.vmem [resolvable:$true] %s28_s13  ;;  %s17_s15 = int_to_ptr.vmem [resolvable:$true] %s16_s15 }
   0x4   :  { %s1905_s16 = scalar_lea.vmem %s29_s13, 1024  ;;  %p1910_p1 = scmp.lt.s32.totalorder %s29_s13, %s29_s13 }
   0x5   :  { %p1906_p0 = scmp.ne.s32.totalorder %s29_s13, %s1905_s16  ;;  %p1911_p2 = scmp.lt.s32.totalorder %s1905_s16, %s1905_s16 }
   0x7   :  { %p1912_p3 = por %p1911_p2, %p1910_p1 }
   0x9   :  { %p1913_p4 = pnand %p1912_p3, %p1906_p0 }
   0xb   :  { %1916 = shalt.err (!%p1913_p4)
}
   0xc   :  { %s1985_s17 = smov 128   ;;  %s1986_s18 = smov 8  }
   0xd   :  { %34 = dma.hbm_to_vmem [thread:$0]  %s2334_s1, 1024, %s29_s13, [#allocation10], %s1985_s17, %s1985_s17, %s1986_s18  }
   0xe   :  { %s1925_s21 = scalar_lea.vmem %s17_s15, 1024  ;;  %p1930_p6 = scmp.lt.s32.totalorder %s17_s15, %s17_s15 }
   0xf   :  { %p1926_p5 = scmp.ne.s32.totalorder %s17_s15, %s1925_s21  ;;  %p1931_p7 = scmp.lt.s32.totalorder %s1925_s21, %s1925_s21 }
  0x11   :  { %p1932_p8 = por %p1931_p7, %p1930_p6 }
  0x13   :  { %p1933_p9 = pnand %p1932_p8, %p1926_p5 }
  0x15   :  { %1936 = shalt.err (!%p1933_p9)
}
  0x16   :  { %22 = dma.hbm_to_vmem [thread:$0]  %s2333_s0, 1024, %s17_s15, [#allocation7], %s1985_s17, %s1985_s17, %s1986_s18  }
  0x17   :  { %s1987_s24 = smov [#allocation11]  }
  0x18   :  { %s40_s25 = sshll.u32 %s1987_s24, 4  ;;  %s41_s25 = int_to_ptr.vmem [resolvable:$true] %s40_s25 }
  0x19   :  { %s1945_s26 = scalar_lea.vmem %s41_s25, 1024  ;;  %p1950_p11 = scmp.lt.s32.totalorder %s41_s25, %s41_s25 }
  0x1a   :  { %p1946_p10 = scmp.ne.s32.totalorder %s41_s25, %s1945_s26  ;;  %p1951_p12 = scmp.lt.s32.totalorder %s1945_s26, %s1945_s26 }
  0x1c   :  { %p1952_p13 = por %p1951_p12, %p1950_p11 }
  0x1e   :  { %p1953_p0 = pnand %p1952_p13, %p1946_p10 }
  0x20   :  { %1956 = shalt.err (!%p1953_p0)
}
  0x21   :  { %46 = dma.hbm_to_vmem [thread:$0]  %s2335_s2, 1024, %s41_s25, [#allocation10], %s1985_s17, %s1985_s17, %s1986_s18  }
  0x22   :  { %1977 = dma.done.wait [#allocation7], 1024  }
  0x23   :  { %1978 = vsyncadd [#allocation7], 4294966272 }
  0x24   :  { %1979 = dma.done.wait [#allocation10], 2048  }
  0x25   :  { %1980 = vsyncadd [#allocation10], 4294965248  ;;  %vm76_vm0 = vcmask 64512   ;;  %v1988_v0 = vmov 0.0   ;;  %vm1989_vm1 = vmmov 0   ;;  %v118_v1 = vld [vmem:[#allocation9] sm:$0xff] }
  0x26   :  { %1757 = vmatprep.subr.mxu0 %v1988_v0  ;;  %102 = vst.msk [vmem:[#allocation5] sm:$0xff] %vm76_vm0, %v1988_v0  ;;  %103 = vst.msk [vmem:[#allocation5 + $0x8] sm:$0xff] %vm76_vm0, %v1988_v0  ;;  %1762 = vmatprep.subr.mxu1 %v1988_v0  ;;  %v119_v2 = vld [vmem:[#allocation9 + $0x8] sm:$0xff]  ;;  %v60_v3 = vld [vmem:[#allocation6] sm:$0xff]  ;;  %vm85_vm2 = vcmask 7168   ;;  %v1990_v33 = vmov -inf  }
  0x27   :  { %104 = vst.msk [vmem:[#allocation5 + $0x10] sm:$0xff] %vm76_vm0, %v1988_v0  ;;  %105 = vst.msk [vmem:[#allocation5 + $0x18] sm:$0xff] %vm76_vm0, %v1988_v0  ;;  %1759 = vmatprep.mubr.msk.f32.mxu0 %vm1989_vm1, %v1988_v0  ;;  %1764 = vmatprep.mubr.msk.f32.mxu1 %vm1989_vm1, %v1988_v0  ;;  %v68_v4 = vmul.f32 0.35355338, %v60_v3  ;;  %v61_v5 = vld [vmem:[#allocation6 + $0x8] sm:$0xff]  ;;  %v62_v6 = vld [vmem:[#allocation6 + $0x10] sm:$0xff] }
  0x28   :  { %106 = vst.msk [vmem:[#allocation5 + $0x20] sm:$0xff] %vm76_vm0, %v1988_v0  ;;  %107 = vst.msk [vmem:[#allocation5 + $0x28] sm:$0xff] %vm76_vm0, %v1988_v0  ;;  %1758 = vmatpush3.xpose.msk.msra.mxu0 %vm76_vm0, %v118_v1  ;;  %1763 = vmatpush3.xpose.msk.msra.mxu1 %vm76_vm0, %v119_v2  ;;  %v69_v7 = vmul.f32 0.35355338, %v61_v5  ;;  %v70_v8 = vmul.f32 0.35355338, %v62_v6 }
  0x29   :  { %108 = vst.msk [vmem:[#allocation5 + $0x30] sm:$0xff] %vm76_vm0, %v1988_v0  ;;  %109 = vst.msk [vmem:[#allocation5 + $0x38] sm:$0xff] %vm76_vm0, %v1988_v0  ;;  %1767 = vmatprep.subr.mxu0 %v1988_v0  ;;  %1772 = vmatprep.subr.mxu1 %v1988_v0  ;;  %v63_v9 = vld [vmem:[#allocation6 + $0x18] sm:$0xff]  ;;  %v64_v11 = vld [vmem:[#allocation6 + $0x20] sm:$0xff]  ;;  %v1991_v55 = vmov 0   ;;  %s1992_s0 = smov [#allocation12]  }
  0x2a   :  { %77 = vst.msk [vmem:[#allocation2] sm:$0xff] %vm76_vm0, %v68_v4  ;;  %v71_v10 = vmul.f32 0.35355338, %v63_v9  ;;  %78 = vst.msk [vmem:[#allocation2 + $0x8] sm:$0xff] %vm76_vm0, %v69_v7  ;;  %v72_v12 = vmul.f32 0.35355338, %v64_v11  ;;  %1847 = vset.pattern.permute.xlu0 %v1991_v55  ;;  %1848 = vset.pattern.permute.xlu1 %v1991_v55 }
  0x2b   :  { %79 = vst.msk [vmem:[#allocation2 + $0x10] sm:$0xff] %vm76_vm0, %v70_v8  ;;  %v65_v13 = vld [vmem:[#allocation6 + $0x28] sm:$0xff]  ;;  %v66_v14 = vld [vmem:[#allocation6 + $0x30] sm:$0xff]  ;;  %v67_v17 = vld [vmem:[#allocation6 + $0x38] sm:$0xff]  ;;  %s1688_s2 = sshll.u32 %s1992_s0, 4  ;;  %s1689_s2 = int_to_ptr.vmem [resolvable:$true] %s1688_s2 }
  0x2c   :  { %80 = vst.msk [vmem:[#allocation2 + $0x18] sm:$0xff] %vm76_vm0, %v71_v10  ;;  %v73_v15 = vmul.f32 0.35355338, %v65_v13  ;;  %v74_v16 = vmul.f32 0.35355338, %v66_v14  ;;  %81 = vst.msk [vmem:[#allocation2 + $0x20] sm:$0xff] %vm76_vm0, %v72_v12  ;;  %p1962_p2 = scmp.lt.s32.totalorder %s1689_s2, %s1689_s2 }
  0x2d   :  { %v75_v18 = vmul.f32 0.35355338, %v67_v17  ;;  %v120_v19 = vld [vmem:[#allocation9 + $0x10] sm:$0xff]  ;;  %v121_v21 = vld [vmem:[#allocation9 + $0x18] sm:$0xff]  ;;  %v122_v25 = vld [vmem:[#allocation9 + $0x20] sm:$0xff]  ;;  %86 = vst.msk [vmem:[#allocation3] sm:$0xff] %vm85_vm2, %v1990_v33 }
  0x2e   :  { %82 = vst.msk [vmem:[#allocation2 + $0x28] sm:$0xff] %vm76_vm0, %v73_v15  ;;  %83 = vst.msk [vmem:[#allocation2 + $0x30] sm:$0xff] %vm76_vm0, %v74_v16  ;;  %v123_v26 = vld [vmem:[#allocation9 + $0x28] sm:$0xff]  ;;  %v124_v29 = vld [vmem:[#allocation9 + $0x30] sm:$0xff]  ;;  %s1957_s28 = scalar_lea.vmem %s1689_s2, 1024 }
  0x2f   :  { %84 = vst.msk [vmem:[#allocation2 + $0x38] sm:$0xff] %vm76_vm0, %v75_v18  ;;  %v125_v30 = vld [vmem:[#allocation9 + $0x38] sm:$0xff]  ;;  %p1958_p1 = scmp.ne.s32.totalorder %s1689_s2, %s1957_s28  ;;  %p1963_p3 = scmp.lt.s32.totalorder %s1957_s28, %s1957_s28 }
  0x30   :  { %87 = vst.msk [vmem:[#allocation3 + $0x8] sm:$0xff] %vm85_vm2, %v1990_v33  ;;  %88 = vst.msk [vmem:[#allocation3 + $0x10] sm:$0xff] %vm85_vm2, %v1990_v33 }
  0x31   :  { %v110_v20 = vld [vmem:[#allocation2] sm:$0xff]  ;;  %v111_v22 = vld [vmem:[#allocation2 + $0x8] sm:$0xff]  ;;  %89 = vst.msk [vmem:[#allocation3 + $0x18] sm:$0xff] %vm85_vm2, %v1990_v33  ;;  %90 = vst.msk [vmem:[#allocation3 + $0x20] sm:$0xff] %vm85_vm2, %v1990_v33  ;;  %p1964_p4 = por %p1963_p3, %p1962_p2 }
  0x32   :  { %1760 = vmatmul.mubr.msk.f32.vlgmr.msra.gmra.mxu0 %vm76_vm0, %v110_v20  ;;  %1765 = vmatmul.mubr.msk.f32.vlgmr.msra.gmra.mxu1 %vm76_vm0, %v111_v22  ;;  %v112_v23 = vld [vmem:[#allocation2 + $0x10] sm:$0xff]  ;;  %91 = vst.msk [vmem:[#allocation3 + $0x28] sm:$0xff] %vm85_vm2, %v1990_v33  ;;  %92 = vst.msk [vmem:[#allocation3 + $0x30] sm:$0xff] %vm85_vm2, %v1990_v33 }
  0x33   :  { %1768 = vmatpush3.xpose.msk.msra.mxu0 %vm76_vm0, %v120_v19  ;;  %1769 = vmatprep.mubr.msk.f32.mxu0 %vm1989_vm1, %v1988_v0  ;;  %v113_v24 = vld [vmem:[#allocation2 + $0x18] sm:$0xff]  ;;  %v114_v27 = vld [vmem:[#allocation2 + $0x20] sm:$0xff]  ;;  %93 = vst.msk [vmem:[#allocation3 + $0x38] sm:$0xff] %vm85_vm2, %v1990_v33  ;;  %94 = vst.msk [vmem:[#allocation4] sm:$0xff] %vm85_vm2, %v1988_v0  ;;  %p1965_p5 = pnand %p1964_p4, %p1958_p1 }
  0x34   :  { %1773 = vmatpush3.xpose.msk.msra.mxu1 %vm76_vm0, %v121_v21  ;;  %1774 = vmatprep.mubr.msk.f32.mxu1 %vm1989_vm1, %v1988_v0  ;;  %95 = vst.msk [vmem:[#allocation4 + $0x8] sm:$0xff] %vm85_vm2, %v1988_v0  ;;  %96 = vst.msk [vmem:[#allocation4 + $0x10] sm:$0xff] %vm85_vm2, %v1988_v0  ;;  %v2157_v59 = vld [vmem:[#allocation3] sm:$0xff] }
  0x35   :  { %1777 = vmatprep.subr.mxu0 %v1988_v0  ;;  %1782 = vmatprep.subr.mxu1 %v1988_v0  ;;  %v115_v28 = vld [vmem:[#allocation2 + $0x28] sm:$0xff]  ;;  %v116_v31 = vld [vmem:[#allocation2 + $0x30] sm:$0xff]  ;;  %97 = vst.msk [vmem:[#allocation4 + $0x18] sm:$0xff] %vm85_vm2, %v1988_v0  ;;  %98 = vst.msk [vmem:[#allocation4 + $0x20] sm:$0xff] %vm85_vm2, %v1988_v0 }
  0x36   :  { %1770 = vmatmul.mubr.msk.f32.vlgmr.msra.gmra.mxu0 %vm76_vm0, %v112_v23  ;;  %v117_v32 = vld [vmem:[#allocation2 + $0x38] sm:$0xff]  ;;  %99 = vst.msk [vmem:[#allocation4 + $0x28] sm:$0xff] %vm85_vm2, %v1988_v0  ;;  %100 = vst.msk [vmem:[#allocation4 + $0x30] sm:$0xff] %vm85_vm2, %v1988_v0 }
  0x37   :  { %1775 = vmatmul.mubr.msk.f32.vlgmr.msra.gmra.mxu1 %vm76_vm0, %v113_v24  ;;  %1778 = vmatpush3.xpose.msk.msra.mxu0 %vm76_vm0, %v122_v25  ;;  %101 = vst.msk [vmem:[#allocation4 + $0x38] sm:$0xff] %vm85_vm2, %v1988_v0  ;;  %v2162_v62 = vld [vmem:[#allocation3 + $0x8] sm:$0xff]  ;;  %v2164_v63 = vld [vmem:[#allocation3 + $0x10] sm:$0xff]  ;;  %v126_v25 = vld [vmem:[#allocation11] sm:$0xff] }
  0x38   :  { %1779 = vmatprep.mubr.msk.f32.mxu0 %vm1989_vm1, %v1988_v0  ;;  %1783 = vmatpush3.xpose.msk.msra.mxu1 %vm76_vm0, %v123_v26  ;;  %v2177_v6 = vld [vmem:[#allocation3 + $0x18] sm:$0xff]  ;;  %v2179_v7 = vld [vmem:[#allocation3 + $0x20] sm:$0xff] }
  0x39   :  { %1784 = vmatprep.mubr.msk.f32.mxu1 %vm1989_vm1, %v1988_v0  ;;  %1787 = vmatprep.subr.mxu0 %v1988_v0  ;;  %v2196_v14 = vld [vmem:[#allocation3 + $0x28] sm:$0xff]  ;;  %v2198_v15 = vld [vmem:[#allocation3 + $0x30] sm:$0xff] }
  0x3a   :  { %1780 = vmatmul.mubr.msk.f32.vlgmr.msra.gmra.mxu0 %vm76_vm0, %v114_v27  ;;  %1792 = vmatprep.subr.mxu1 %v1988_v0  ;;  %v2215_v22 = vld [vmem:[#allocation3 + $0x38] sm:$0xff] }
  0x3b   :  { %1785 = vmatmul.mubr.msk.f32.vlgmr.msra.gmra.mxu1 %vm76_vm0, %v115_v28  ;;  %1788 = vmatpush3.xpose.msk.msra.mxu0 %vm76_vm0, %v124_v29  ;;  %v127_v29 = vld [vmem:[#allocation11 + $0x8] sm:$0xff] }
  0x3c   :  { %1789 = vmatprep.mubr.msk.f32.mxu0 %vm1989_vm1, %v1988_v0  ;;  %1793 = vmatpush3.xpose.msk.msra.mxu1 %vm76_vm0, %v125_v30 }
  0x3d   :  { %1794 = vmatprep.mubr.msk.f32.mxu1 %vm1989_vm1, %v1988_v0  ;;  %1797 = vmatprep.subr.mxu0 %v1988_v0 }
  0x3e   :  { %1790 = vmatmul.mubr.msk.f32.vlgmr.msra.gmra.mxu0 %vm76_vm0, %v116_v31  ;;  %1802 = vmatprep.subr.mxu1 %v1988_v0 }
  0x3f   :  { %1795 = vmatmul.mubr.msk.f32.vlgmr.msra.gmra.mxu1 %vm76_vm0, %v117_v32  ;;  %1799 = vmatprep.mubr.msk.f32.mxu0 %vm1989_vm1, %v1988_v0 }
  0x40   :  { %1804 = vmatprep.mubr.msk.f32.mxu1 %vm1989_vm1, %v1988_v0  ;;  %1798 = vmatpush3.msra.mxu0 %v126_v25 }
  0x41   :  { %1807 = vmatprep.subr.mxu0 %v1988_v0  ;;  %1803 = vmatpush3.msra.mxu1 %v127_v29 }
  0x42   :  { %1812 = vmatprep.subr.mxu1 %v1988_v0 }
  0xf2   :  { %v2125_v34 = vpop.f32.mrf.mxu0  ;;  %v2127_v35 = vpop.f32.mrf.mxu1 }
  0xf3   :  { %v751_v36 = vsel %vm76_vm0, %v2125_v34, -inf  ;;  %v754_v39 = vsel %vm76_vm0, %v2127_v35, -inf }
  0xf4   :  { %752 = vmax.xlane.f32.xlu0 %v751_v36  ;;  %v1761_v37 = vpop.f32.mrf.mxu0  ;;  %v1766_v38 = vpop.f32.mrf.mxu1 }
  0xf6   :  { %v2133_v40 = vpop.f32.mrf.mxu0 }
  0xf7   :  { %v2135_v41 = vpop.f32.mrf.mxu1  ;;  %v757_v42 = vsel %vm76_vm0, %v2133_v40, -inf }
  0xf8   :  { %755 = vmax.xlane.f32.xlu0 %v754_v39  ;;  %v1771_v43 = vpop.f32.mrf.mxu0  ;;  %758 = vmax.xlane.f32.xlu1 %v757_v42  ;;  %v760_v45 = vsel %vm76_vm0, %v2135_v41, -inf }
  0xf9   :  { %v1776_v44 = vpop.f32.mrf.mxu1 }
  0xfa   :  { %v2141_v46 = vpop.f32.mrf.mxu0 }
  0xfb   :  { %v2143_v47 = vpop.f32.mrf.mxu1  ;;  %v763_v48 = vsel %vm76_vm0, %v2141_v46, -inf }
  0xfc   :  { %761 = vmax.xlane.f32.xlu1 %v760_v45  ;;  %v1781_v49 = vpop.f32.mrf.mxu0  ;;  %764 = vmax.xlane.f32.xlu0 %v763_v48  ;;  %v766_v51 = vsel %vm76_vm0, %v2143_v47, -inf }
  0xfd   :  { %v1786_v50 = vpop.f32.mrf.mxu1  ;;  %v128_v49 = vld [vmem:[#allocation11 + $0x10] sm:$0xff] }
  0xfe   :  { %v2149_v52 = vpop.f32.mrf.mxu0 }
  0xff   :  { %v2151_v53 = vpop.f32.mrf.mxu1  ;;  %v769_v54 = vsel %vm76_vm0, %v2149_v52, -inf }
 0x100   :  { %767 = vmax.xlane.f32.xlu1 %v766_v51  ;;  %v1791_v56 = vpop.f32.mrf.mxu0  ;;  %770 = vmax.xlane.f32.xlu0 %v769_v54  ;;  %v772_v58 = vsel %vm76_vm0, %v2151_v53, -inf }
 0x101   :  { %v1796_v57 = vpop.f32.mrf.mxu1 }
 0x104   :  { %773 = vmax.xlane.f32.xlu1 %v772_v58 }
 0x17d   :  { %v753_v60 = vpop.xlane.xlu0 %752 }
 0x17e   :  { %v2160_v61 = vmax.f32 %v2157_v59, %v753_v60 }
 0x180   :  { %v783_v1 = vsub.f32 %v2157_v59, %v2160_v61  ;;  %1584 = vst.msk [vmem:[#allocation3] sm:$0xff] %vm85_vm2, %v2160_v61  ;;  %809 = vperm.xlu0 %1847, %v2160_v61  }
 0x181   :  { %v756_v2 = vpop.xlane.xlu0 %755  ;;  %v759_v3 = vpop.xlane.xlu1 %758 }
 0x182   :  { %v2172_v4 = vmax.f32 %v2162_v62, %v756_v2  ;;  %v2175_v5 = vmax.f32 %v2164_v63, %v759_v3 }
 0x184   :  { %v784_v8 = vsub.f32 %v2162_v62, %v2172_v4  ;;  %1585 = vst.msk [vmem:[#allocation3 + $0x8] sm:$0xff] %vm85_vm2, %v2172_v4  ;;  %814 = vperm.xlu1 %1848, %v2172_v4   ;;  %v785_v9 = vsub.f32 %v2164_v63, %v2175_v5  ;;  %1586 = vst.msk [vmem:[#allocation3 + $0x10] sm:$0xff] %vm85_vm2, %v2175_v5 }
 0x185   :  { %v762_v10 = vpop.xlane.xlu1 %761  ;;  %v765_v11 = vpop.xlane.xlu0 %764 }
 0x186   :  { %v2191_v12 = vmax.f32 %v2177_v6, %v762_v10  ;;  %v2194_v13 = vmax.f32 %v2179_v7, %v765_v11 }
 0x188   :  { %819 = vperm.xlu1 %1848, %v2175_v5   ;;  %v786_v16 = vsub.f32 %v2177_v6, %v2191_v12  ;;  %1587 = vst.msk [vmem:[#allocation3 + $0x18] sm:$0xff] %vm85_vm2, %v2191_v12  ;;  %v787_v17 = vsub.f32 %v2179_v7, %v2194_v13  ;;  %1588 = vst.msk [vmem:[#allocation3 + $0x20] sm:$0xff] %vm85_vm2, %v2194_v13 }
 0x189   :  { %v768_v18 = vpop.xlane.xlu1 %767  ;;  %v771_v19 = vpop.xlane.xlu0 %770 }
 0x18a   :  { %v2210_v20 = vmax.f32 %v2196_v14, %v768_v18  ;;  %v2213_v21 = vmax.f32 %v2198_v15, %v771_v19  ;;  %v797_v62 = vmul.f32 1.442695, %v786_v16  ;;  %v799_v4 = vmul.f32 1.442695, %v787_v17  ;;  %v872_v17 = vld [vmem:[#allocation4 + $0x8] sm:$0xff] }
 0x18c   :  { %824 = vperm.xlu1 %1848, %v2191_v12   ;;  %v788_v23 = vsub.f32 %v2196_v14, %v2210_v20  ;;  %1589 = vst.msk [vmem:[#allocation3 + $0x28] sm:$0xff] %vm85_vm2, %v2210_v20  ;;  %v789_v24 = vsub.f32 %v2198_v15, %v2213_v21  ;;  %1590 = vst.msk [vmem:[#allocation3 + $0x30] sm:$0xff] %vm85_vm2, %v2213_v21  ;;  %v871_v14 = vld [vmem:[#allocation4] sm:$0xff] }
 0x18d   :  { %v774_v26 = vpop.xlane.xlu1 %773 }
 0x18e   :  { %v2227_v27 = vmax.f32 %v2215_v22, %v774_v26  ;;  %v132_v26 = vld [vmem:[#allocation11 + $0x30] sm:$0xff]  ;;  %v801_v59 = vmul.f32 1.442695, %v788_v23  ;;  %v803_v61 = vmul.f32 1.442695, %v789_v24 }
 0x18f   :  { %v873_v23 = vld [vmem:[#allocation4 + $0x10] sm:$0xff] }
 0x190   :  { %829 = vperm.xlu1 %1848, %v2194_v13   ;;  %v790_v28 = vsub.f32 %v2215_v22, %v2227_v27  ;;  %1591 = vst.msk [vmem:[#allocation3 + $0x38] sm:$0xff] %vm85_vm2, %v2227_v27 }
 0x192   :  { %v805_v63 = vmul.f32 1.442695, %v790_v28 }
 0x194   :  { %834 = vperm.xlu1 %1848, %v2210_v20  }
 0x198   :  { %839 = vperm.xlu1 %1848, %v2213_v21  }
 0x19c   :  { %844 = vperm.xlu1 %1848, %v2227_v27  }
 0x1fb   :  { %v810_v30 = vpop.permute.xlu0 %809 }
 0x1fc   :  { %v847_v31 = vsub.f32 %v2125_v34, %v810_v30  ;;  %v133_v30 = vld [vmem:[#allocation11 + $0x38] sm:$0xff] }
 0x1fe   :  { %v855_v32 = vmul.f32 1.442695, %v847_v31 }
 0x1ff   :  { %v815_v33 = vpop.permute.xlu1 %814 }
 0x200   :  { %1849 = vpow2.f32 %v855_v32  ;;  %v848_v36 = vsub.f32 %v2127_v35, %v815_v33 }
 0x202   :  { %v857_v37 = vmul.f32 1.442695, %v848_v36 }
 0x203   :  { %v820_v38 = vpop.permute.xlu1 %819 }
 0x204   :  { %1851 = vpow2.f32 %v857_v37  ;;  %v849_v39 = vsub.f32 %v2133_v40, %v820_v38  ;;  %v793_v38 = vmul.f32 1.442695, %v784_v8 }
 0x206   :  { %v859_v42 = vmul.f32 1.442695, %v849_v39 }
 0x207   :  { %v825_v43 = vpop.permute.xlu1 %824 }
 0x208   :  { %1853 = vpow2.f32 %v859_v42  ;;  %v850_v44 = vsub.f32 %v2135_v41, %v825_v43  ;;  %v129_v41 = vld [vmem:[#allocation11 + $0x18] sm:$0xff]  ;;  %v791_v42 = vmul.f32 1.442695, %v783_v1 }
 0x209   :  { %v874_v43 = vld [vmem:[#allocation4 + $0x18] sm:$0xff] }
 0x20a   :  { %v861_v45 = vmul.f32 1.442695, %v850_v44 }
 0x20b   :  { %v830_v48 = vpop.permute.xlu1 %829 }
 0x20c   :  { %1855 = vpow2.f32 %v861_v45  ;;  %v851_v34 = vsub.f32 %v2141_v46, %v830_v48 }
 0x20d   :  { %v1850_v50 = vpop.eup %1849 }
 0x20e   :  { %v863_v51 = vmul.f32 1.442695, %v851_v34  ;;  %1800 = vmatmul.mubr.msk.f32.vlgmr.msra.gmra.mxu0 %vm76_vm0, %v1850_v50  ;;  %v887_v35 = vsel %vm76_vm0, %v1850_v50, 0.0 }
 0x20f   :  { %v835_v54 = vpop.permute.xlu1 %834  ;;  %888 = vadd.xlane.f32.xlu1 %v887_v35  ;;  %1808 = vmatpush3.msra.mxu0 %v128_v49  ;;  %v875_v49 = vld [vmem:[#allocation4 + $0x20] sm:$0xff] }
 0x210   :  { %1857 = vpow2.f32 %v863_v51  ;;  %v852_v40 = vsub.f32 %v2143_v47, %v835_v54  ;;  %1809 = vmatprep.mubr.msk.f32.mxu0 %vm1989_vm1, %v1988_v0  ;;  %1817 = vmatprep.subr.mxu0 %v1988_v0  ;;  %v130_v47 = vld [vmem:[#allocation11 + $0x20] sm:$0xff] }
 0x211   :  { %v1852_v46 = vpop.eup %1851 }
 0x212   :  { %v865_v55 = vmul.f32 1.442695, %v852_v40  ;;  %1805 = vmatmul.mubr.msk.f32.vlgmr.msra.gmra.mxu1 %vm76_vm0, %v1852_v46  ;;  %v890_v56 = vsel %vm76_vm0, %v1852_v46, 0.0  ;;  %v876_v40 = vld [vmem:[#allocation4 + $0x28] sm:$0xff] }
 0x213   :  { %891 = vadd.xlane.f32.xlu0 %v890_v56  ;;  %v840_v57 = vpop.permute.xlu1 %839  ;;  %1813 = vmatpush3.msra.mxu1 %v129_v41 }
 0x214   :  { %1859 = vpow2.f32 %v865_v55  ;;  %v853_v58 = vsub.f32 %v2149_v52, %v840_v57  ;;  %1814 = vmatprep.mubr.msk.f32.mxu1 %vm1989_vm1, %v1988_v0  ;;  %1822 = vmatprep.subr.mxu1 %v1988_v0  ;;  %v131_v52 = vld [vmem:[#allocation11 + $0x28] sm:$0xff]  ;;  %v877_v57 = vld [vmem:[#allocation4 + $0x30] sm:$0xff] }
 0x215   :  { %v1854_v60 = vpop.eup %1853 }
 0x216   :  { %v867_v2 = vmul.f32 1.442695, %v853_v58  ;;  %1810 = vmatmul.mubr.msk.f32.vlgmr.msra.gmra.mxu0 %vm76_vm0, %v1854_v60  ;;  %v893_v3 = vsel %vm76_vm0, %v1854_v60, 0.0 }
 0x217   :  { %894 = vadd.xlane.f32.xlu0 %v893_v3  ;;  %v845_v10 = vpop.permute.xlu1 %844  ;;  %1818 = vmatpush3.msra.mxu0 %v130_v47 }
 0x218   :  { %1861 = vpow2.f32 %v867_v2  ;;  %v854_v11 = vsub.f32 %v2151_v53, %v845_v10  ;;  %1819 = vmatprep.mubr.msk.f32.mxu0 %vm1989_vm1, %v1988_v0  ;;  %1827 = vmatprep.subr.mxu0 %v1988_v0  ;;  %v878_v10 = vld [vmem:[#allocation4 + $0x38] sm:$0xff] }
 0x219   :  { %v1856_v18 = vpop.eup %1855 }
 0x21a   :  { %v869_v19 = vmul.f32 1.442695, %v854_v11  ;;  %1815 = vmatmul.mubr.msk.f32.vlgmr.msra.gmra.mxu1 %vm76_vm0, %v1856_v18  ;;  %v896_v25 = vsel %vm76_vm0, %v1856_v18, 0.0 }
 0x21b   :  { %897 = vadd.xlane.f32.xlu1 %v896_v25  ;;  %1823 = vmatpush3.msra.mxu1 %v131_v52 }
 0x21c   :  { %1863 = vpow2.f32 %v869_v19  ;;  %1824 = vmatprep.mubr.msk.f32.mxu1 %vm1989_vm1, %v1988_v0  ;;  %1832 = vmatprep.subr.mxu1 %v1988_v0 }
 0x21d   :  { %v1858_v53 = vpop.eup %1857  ;;  %1865 = vpow2.f32 %v793_v38  ;;  %v1512_v38 = vld [vmem:[#allocation5] sm:$0xff] }
 0x21e   :  { %1820 = vmatmul.mubr.msk.f32.vlgmr.msra.gmra.mxu0 %vm76_vm0, %v1858_v53  ;;  %v899_v29 = vsel %vm76_vm0, %v1858_v53, 0.0  ;;  %1867 = vpow2.f32 %v791_v42 }
 0x21f   :  { %900 = vadd.xlane.f32.xlu0 %v899_v29  ;;  %1828 = vmatpush3.msra.mxu0 %v132_v26 }
 0x220   :  { %1829 = vmatprep.mubr.msk.f32.mxu0 %vm1989_vm1, %v1988_v0 }
 0x221   :  { %v1860_v31 = vpop.eup %1859 }
 0x222   :  { %1825 = vmatmul.mubr.msk.f32.vlgmr.msra.gmra.mxu1 %vm76_vm0, %v1860_v31  ;;  %v902_v32 = vsel %vm76_vm0, %v1860_v31, 0.0 }
 0x223   :  { %903 = vadd.xlane.f32.xlu1 %v902_v32  ;;  %1833 = vmatpush3.msra.mxu1 %v133_v30 }
 0x224   :  { %1834 = vmatprep.mubr.msk.f32.mxu1 %vm1989_vm1, %v1988_v0  ;;  %v795_v0 = vmul.f32 1.442695, %v785_v9 }
 0x225   :  { %v1862_v33 = vpop.eup %1861 }
 0x226   :  { %1830 = vmatmul.mubr.msk.f32.vlgmr.msra.gmra.mxu0 %vm76_vm0, %v1862_v33  ;;  %v905_v36 = vsel %vm76_vm0, %v1862_v33, 0.0  ;;  %1869 = vpow2.f32 %v795_v0 }
 0x227   :  { %906 = vadd.xlane.f32.xlu0 %v905_v36  ;;  %1871 = vpow2.f32 %v797_v62 }
 0x228   :  { %1873 = vpow2.f32 %v799_v4  ;;  %v1513_v4 = vld [vmem:[#allocation5 + $0x8] sm:$0xff] }
 0x229   :  { %v1864_v37 = vpop.eup %1863  ;;  %1875 = vpow2.f32 %v801_v59 }
 0x22a   :  { %1835 = vmatmul.mubr.msk.f32.vlgmr.msra.gmra.mxu1 %vm76_vm0, %v1864_v37  ;;  %v908_v39 = vsel %vm76_vm0, %v1864_v37, 0.0  ;;  %1877 = vpow2.f32 %v803_v61  ;;  %v1866_v1 = vpop.eup %1865 }
 0x22b   :  { %909 = vadd.xlane.f32.xlu1 %v908_v39  ;;  %1879 = vpow2.f32 %v805_v63  ;;  %v1868_v5 = vpop.eup %1867  ;;  %v880_v21 = vmul.f32 %v1866_v1, %v872_v17 }
 0x22c   :  { %v879_v15 = vmul.f32 %v1868_v5, %v871_v14 }
 0x233   :  { %v1870_v6 = vpop.eup %1869 }
 0x234   :  { %v1872_v7 = vpop.eup %1871  ;;  %v881_v27 = vmul.f32 %v1870_v6, %v873_v23 }
 0x235   :  { %v1874_v8 = vpop.eup %1873  ;;  %v882_v48 = vmul.f32 %v1872_v7, %v874_v43  ;;  %v1517_v43 = vld [vmem:[#allocation5 + $0x28] sm:$0xff] }
 0x236   :  { %v1876_v9 = vpop.eup %1875  ;;  %v883_v35 = vmul.f32 %v1874_v8, %v875_v49 }
 0x237   :  { %v1878_v12 = vpop.eup %1877  ;;  %v884_v55 = vmul.f32 %v1876_v9, %v876_v40 }
 0x238   :  { %v1880_v13 = vpop.eup %1879  ;;  %v885_v60 = vmul.f32 %v1878_v12, %v877_v57 }
 0x239   :  { %v886_v18 = vmul.f32 %v1880_v13, %v878_v10 }
 0x23c   :  { %1527 = vperm.xlu1 %1848, %v1866_v1  }
 0x23d   :  { %1522 = vperm.xlu0 %1847, %v1868_v5   ;;  %v1514_v5 = vld [vmem:[#allocation5 + $0x10] sm:$0xff] }
 0x240   :  { %1532 = vperm.xlu1 %1848, %v1870_v6  }
 0x241   :  { %1537 = vperm.xlu0 %1847, %v1872_v7  }
 0x244   :  { %1542 = vperm.xlu1 %1848, %v1874_v8  }
 0x245   :  { %1547 = vperm.xlu0 %1847, %v1876_v9  }
 0x248   :  { %1552 = vperm.xlu1 %1848, %v1878_v12  }
 0x249   :  { %1557 = vperm.xlu0 %1847, %v1880_v13   ;;  %v1515_v13 = vld [vmem:[#allocation5 + $0x18] sm:$0xff] }
 0x298   :  { %v889_v16 = vpop.xlane.xlu1 %888 }
 0x299   :  { %v911_v20 = vadd.f32 %v889_v16, %v879_v15 }
 0x29b   :  { %920 = vst.msk [vmem:[#allocation4] sm:$0xff] %vm85_vm2, %v911_v20 }
 0x29c   :  { %v892_v22 = vpop.xlane.xlu0 %891 }
 0x29d   :  { %v912_v24 = vadd.f32 %v892_v22, %v880_v21  ;;  %v1516_v21 = vld [vmem:[#allocation5 + $0x20] sm:$0xff] }
 0x29f   :  { %921 = vst.msk [vmem:[#allocation4 + $0x8] sm:$0xff] %vm85_vm2, %v912_v24 }
 0x2a0   :  { %v895_v28 = vpop.xlane.xlu0 %894 }
 0x2a1   :  { %v913_v44 = vadd.f32 %v895_v28, %v881_v27 }
 0x2a2   :  { %v1595_v45 = vld [vmem:[#allocation4] sm:$0xff] }
 0x2a3   :  { %922 = vst.msk [vmem:[#allocation4 + $0x10] sm:$0xff] %vm85_vm2, %v913_v44  ;;  %1881 = vrcp.f32 %v1595_v45 }
 0x2a4   :  { %v898_v34 = vpop.xlane.xlu1 %897 }
 0x2a5   :  { %v914_v50 = vadd.f32 %v898_v34, %v882_v48 }
 0x2a6   :  { %v1596_v51 = vld [vmem:[#allocation4 + $0x8] sm:$0xff] }
 0x2a7   :  { %923 = vst.msk [vmem:[#allocation4 + $0x18] sm:$0xff] %vm85_vm2, %v914_v50  ;;  %1883 = vrcp.f32 %v1596_v51  ;;  %v1518_v50 = vld [vmem:[#allocation5 + $0x30] sm:$0xff] }
 0x2a8   :  { %v901_v54 = vpop.xlane.xlu0 %900 }
 0x2a9   :  { %v915_v41 = vadd.f32 %v901_v54, %v883_v35 }
 0x2aa   :  { %v1597_v46 = vld [vmem:[#allocation4 + $0x10] sm:$0xff] }
 0x2ab   :  { %924 = vst.msk [vmem:[#allocation4 + $0x20] sm:$0xff] %vm85_vm2, %v915_v41  ;;  %1885 = vrcp.f32 %v1597_v46  ;;  %v1519_v46 = vld [vmem:[#allocation5 + $0x38] sm:$0xff] }
 0x2ac   :  { %v904_v56 = vpop.xlane.xlu1 %903 }
 0x2ad   :  { %v916_v58 = vadd.f32 %v904_v56, %v884_v55 }
 0x2ae   :  { %v1598_v47 = vld [vmem:[#allocation4 + $0x18] sm:$0xff] }
 0x2af   :  { %925 = vst.msk [vmem:[#allocation4 + $0x28] sm:$0xff] %vm85_vm2, %v916_v58  ;;  %1887 = vrcp.f32 %v1598_v47 }
 0x2b0   :  { %v1882_v2 = vpop.eup %1881  ;;  %v907_v3 = vpop.xlane.xlu0 %906 }
 0x2b1   :  { %v917_v11 = vadd.f32 %v907_v3, %v885_v60  ;;  %1629 = vperm.xlu1 %1848, %v1882_v2  }
 0x2b2   :  { %v1599_v52 = vld [vmem:[#allocation4 + $0x20] sm:$0xff] }
 0x2b3   :  { %926 = vst.msk [vmem:[#allocation4 + $0x30] sm:$0xff] %vm85_vm2, %v917_v11  ;;  %1889 = vrcp.f32 %v1599_v52 }
 0x2b4   :  { %v1884_v19 = vpop.eup %1883  ;;  %v910_v25 = vpop.xlane.xlu1 %909 }
 0x2b5   :  { %v918_v26 = vadd.f32 %v910_v25, %v886_v18  ;;  %1634 = vperm.xlu0 %1847, %v1884_v19  }
 0x2b6   :  { %v1600_v53 = vld [vmem:[#allocation4 + $0x28] sm:$0xff] }
 0x2b7   :  { %927 = vst.msk [vmem:[#allocation4 + $0x38] sm:$0xff] %vm85_vm2, %v918_v26  ;;  %1891 = vrcp.f32 %v1600_v53 }
 0x2b8   :  { %v1886_v29 = vpop.eup %1885  ;;  %v1523_v39 = vpop.permute.xlu0 %1522 }
 0x2b9   :  { %1639 = vperm.xlu1 %1848, %v1886_v29   ;;  %v1528_v0 = vpop.permute.xlu1 %1527  ;;  %v1560_v62 = vmul.f32 %v1523_v39, %v1512_v38 }
 0x2ba   :  { %v1601_v30 = vld [vmem:[#allocation4 + $0x30] sm:$0xff]  ;;  %v1561_v1 = vmul.f32 %v1528_v0, %v1513_v4 }
 0x2bb   :  { %1893 = vrcp.f32 %v1601_v30 }
 0x2bc   :  { %v1888_v31 = vpop.eup %1887  ;;  %v1538_v14 = vpop.permute.xlu0 %1537 }
 0x2bd   :  { %1644 = vperm.xlu0 %1847, %v1888_v31   ;;  %v1533_v6 = vpop.permute.xlu1 %1532  ;;  %v1563_v20 = vmul.f32 %v1538_v14, %v1515_v13 }
 0x2be   :  { %v1602_v32 = vld [vmem:[#allocation4 + $0x38] sm:$0xff]  ;;  %v1562_v12 = vmul.f32 %v1533_v6, %v1514_v5 }
 0x2bf   :  { %1895 = vrcp.f32 %v1602_v32 }
 0x2c0   :  { %v1890_v33 = vpop.eup %1889  ;;  %v1548_v44 = vpop.permute.xlu0 %1547 }
 0x2c1   :  { %1649 = vperm.xlu1 %1848, %v1890_v33   ;;  %v1543_v22 = vpop.permute.xlu1 %1542  ;;  %v1565_v49 = vmul.f32 %v1548_v44, %v1517_v43 }
 0x2c2   :  { %v1564_v28 = vmul.f32 %v1543_v22, %v1516_v21 }
 0x2c4   :  { %v1892_v36 = vpop.eup %1891  ;;  %v1558_v55 = vpop.permute.xlu0 %1557 }
 0x2c5   :  { %1654 = vperm.xlu0 %1847, %v1892_v36   ;;  %v1553_v51 = vpop.permute.xlu1 %1552  ;;  %v1567_v47 = vmul.f32 %v1558_v55, %v1519_v46 }
 0x2c6   :  { %v1566_v41 = vmul.f32 %v1553_v51, %v1518_v50 }
 0x2c8   :  { %v1894_v37 = vpop.eup %1893 }
 0x2c9   :  { %1659 = vperm.xlu1 %1848, %v1894_v37  }
 0x2cc   :  { %v1896_v42 = vpop.eup %1895 }
 0x2cd   :  { %1664 = vperm.xlu0 %1847, %v1896_v42  }
 0x2ce   :  { %v997_v59 = vpop.f32.mrf.mxu0 }
 0x2cf   :  { %v1568_v61 = vadd.f32 %v1560_v62, %v997_v59 }
 0x2d0   :  { %v1801_v63 = vpop.f32.mrf.mxu0 }
 0x2d1   :  { %1576 = vst.msk [vmem:[#allocation5] sm:$0xff] %vm76_vm0, %v1568_v61 }
 0x2d2   :  { %v1070_v7 = vpop.f32.mrf.mxu1 }
 0x2d3   :  { %v1569_v8 = vadd.f32 %v1561_v1, %v1070_v7 }
 0x2d4   :  { %v1806_v9 = vpop.f32.mrf.mxu1 }
 0x2d5   :  { %1577 = vst.msk [vmem:[#allocation5 + $0x8] sm:$0xff] %vm76_vm0, %v1569_v8 }
 0x2d6   :  { %v1143_v15 = vpop.f32.mrf.mxu0 }
 0x2d7   :  { %v1570_v16 = vadd.f32 %v1562_v12, %v1143_v15 }
 0x2d8   :  { %v1811_v17 = vpop.f32.mrf.mxu0  ;;  %v1619_v11 = vld [vmem:[#allocation5] sm:$0xff] }
 0x2d9   :  { %1578 = vst.msk [vmem:[#allocation5 + $0x10] sm:$0xff] %vm76_vm0, %v1570_v16 }
 0x2da   :  { %v1216_v23 = vpop.f32.mrf.mxu1 }
 0x2db   :  { %v1571_v24 = vadd.f32 %v1563_v20, %v1216_v23 }
 0x2dc   :  { %v1816_v27 = vpop.f32.mrf.mxu1  ;;  %v1620_v18 = vld [vmem:[#allocation5 + $0x8] sm:$0xff] }
 0x2dd   :  { %1579 = vst.msk [vmem:[#allocation5 + $0x18] sm:$0xff] %vm76_vm0, %v1571_v24 }
 0x2de   :  { %v1289_v45 = vpop.f32.mrf.mxu0 }
 0x2df   :  { %v1572_v48 = vadd.f32 %v1564_v28, %v1289_v45 }
 0x2e0   :  { %v1821_v34 = vpop.f32.mrf.mxu0  ;;  %v1621_v53 = vld [vmem:[#allocation5 + $0x10] sm:$0xff] }
 0x2e1   :  { %1580 = vst.msk [vmem:[#allocation5 + $0x20] sm:$0xff] %vm76_vm0, %v1572_v48 }
 0x2e2   :  { %v1362_v35 = vpop.f32.mrf.mxu1 }
 0x2e3   :  { %v1573_v54 = vadd.f32 %v1565_v49, %v1362_v35 }
 0x2e4   :  { %v1826_v40 = vpop.f32.mrf.mxu1  ;;  %v1622_v30 = vld [vmem:[#allocation5 + $0x18] sm:$0xff] }
 0x2e5   :  { %1581 = vst.msk [vmem:[#allocation5 + $0x28] sm:$0xff] %vm76_vm0, %v1573_v54 }
 0x2e6   :  { %v1435_v56 = vpop.f32.mrf.mxu0 }
 0x2e7   :  { %v1574_v57 = vadd.f32 %v1566_v41, %v1435_v56 }
 0x2e8   :  { %v1831_v58 = vpop.f32.mrf.mxu0  ;;  %v1623_v36 = vld [vmem:[#allocation5 + $0x20] sm:$0xff] }
 0x2e9   :  { %1582 = vst.msk [vmem:[#allocation5 + $0x30] sm:$0xff] %vm76_vm0, %v1574_v57 }
 0x2ea   :  { %v1508_v60 = vpop.f32.mrf.mxu1 }
 0x2eb   :  { %v1575_v2 = vadd.f32 %v1567_v47, %v1508_v60 }
 0x2ec   :  { %v1836_v3 = vpop.f32.mrf.mxu1  ;;  %v1624_v38 = vld [vmem:[#allocation5 + $0x28] sm:$0xff] }
 0x2ed   :  { %1583 = vst.msk [vmem:[#allocation5 + $0x38] sm:$0xff] %vm76_vm0, %v1575_v2 }
 0x2f0   :  { %v1625_v62 = vld [vmem:[#allocation5 + $0x30] sm:$0xff] }
 0x2f4   :  { %v1626_v59 = vld [vmem:[#allocation5 + $0x38] sm:$0xff] }
 0x32c   :  { %v1630_v10 = vpop.permute.xlu1 %1629 }
 0x32d   :  { %v1667_v52 = vmul.f32 %v1630_v10, %v1619_v11 }
 0x32f   :  { %1675 = vst.msk [vmem:[#allocation12] sm:$0xff] %vm76_vm0, %v1667_v52 }
 0x330   :  { %v1635_v19 = vpop.permute.xlu0 %1634 }
 0x331   :  { %v1668_v25 = vmul.f32 %v1635_v19, %v1620_v18 }
 0x333   :  { %1676 = vst.msk [vmem:[#allocation12 + $0x8] sm:$0xff] %vm76_vm0, %v1668_v25 }
 0x334   :  { %v1640_v26 = vpop.permute.xlu1 %1639 }
 0x335   :  { %v1669_v29 = vmul.f32 %v1640_v26, %v1621_v53 }
 0x337   :  { %1677 = vst.msk [vmem:[#allocation12 + $0x10] sm:$0xff] %vm76_vm0, %v1669_v29 }
 0x338   :  { %v1645_v31 = vpop.permute.xlu0 %1644 }
 0x339   :  { %v1670_v32 = vmul.f32 %v1645_v31, %v1622_v30 }
 0x33b   :  { %1678 = vst.msk [vmem:[#allocation12 + $0x18] sm:$0xff] %vm76_vm0, %v1670_v32 }
 0x33c   :  { %v1650_v33 = vpop.permute.xlu1 %1649 }
 0x33d   :  { %v1671_v37 = vmul.f32 %v1650_v33, %v1623_v36 }
 0x33f   :  { %1679 = vst.msk [vmem:[#allocation12 + $0x20] sm:$0xff] %vm76_vm0, %v1671_v37 }
 0x340   :  { %v1655_v39 = vpop.permute.xlu0 %1654 }
 0x341   :  { %v1672_v42 = vmul.f32 %v1655_v39, %v1624_v38 }
 0x343   :  { %1680 = vst.msk [vmem:[#allocation12 + $0x28] sm:$0xff] %vm76_vm0, %v1672_v42 }
 0x344   :  { %v1660_v0 = vpop.permute.xlu1 %1659 }
 0x345   :  { %v1673_v4 = vmul.f32 %v1660_v0, %v1625_v62 }
 0x347   :  { %1681 = vst.msk [vmem:[#allocation12 + $0x30] sm:$0xff] %vm76_vm0, %v1673_v4 }
 0x348   :  { %v1665_v61 = vpop.permute.xlu0 %1664 }
 0x349   :  { %v1674_v63 = vmul.f32 %v1665_v61, %v1626_v59 }
 0x34b   :  { %1682 = vst.msk [vmem:[#allocation12 + $0x38] sm:$0xff] %vm76_vm0, %v1674_v63 }
 0x34c   :  { %1968 = shalt.err (!%p1965_p5)
}
 0x34d   :  { %1694 = dma.vmem_to_hbm [thread:$0]  %s1689_s2, 1024, %s2336_s3, [#allocation8], %s1985_s17, %s1985_s17, %s1986_s18  }
 0x34e   :  { %1981 = dma.done.wait [#allocation8], 1024  }
 0x34f   :  { %1982 = vsyncadd [#allocation8], 4294966272 }
 0x350   :  { %1698 = vsyncpa [#allocation7], 1 }
 0x351   :  { %1699 = vsyncpa [#allocation10], 1 }
 0x352   :  { %1700 = vsyncpa [#allocation8], 1 }

</bundles_post_ra>
